<compile_context>
chip_gen: v6e
topology: v6e:2x2x1
jax: 0.10.0
libtpu: 0.0.40
codegen_flags: <defaults>
</compile_context>

<pallas_src>
import jax
import jax.numpy as jnp
from jax import lax
from jax.experimental import pallas as pl
from jax.experimental.pallas import tpu as pltpu

EPS = 1e-5

# ---------------- model hyper-parameters (the "args" of the PyTorch code) ----
SEQ_LEN = 8
BATCH = 2
EMBED_SIZE = 32
HIDDEN_SIZE = 32
NUM_LAYERS = 2
OUTPUTCLASS = 64
U_BOUND = 1.0            # pow(MAG, 1/seq_len) ~ 1 in the original code

assert EMBED_SIZE == HIDDEN_SIZE, "packed (batch-in-lanes) layout assumes E == H"

TB = SEQ_LEN * BATCH
NPAD = ((OUTPUTCLASS + 127) // 128) * 128   # lane-dense decoder output width (128)
BH = BATCH * HIDDEN_SIZE                    # packed activation width (64)
BNPAD = BATCH * NPAD                        # packed decoder width (256)

# ---------------- packed parameter slab row layout (all sections 8-aligned) --
_OFF_W0 = 0                                       # (B*C, BH)  embedding ⊗ W0, block-diag
_OFF_WMID = _OFF_W0 + BATCH * OUTPUTCLASS         # NUM_LAYERS blocks (BH,BH): di1..di(L-1), last_fc
_OFF_SC = _OFF_WMID + NUM_LAYERS * BH             # (L+2) scale tables (T,BH): layers, last, extra
_OFF_SH = _OFF_SC + (NUM_LAYERS + 2) * SEQ_LEN    # (L+1) shift tables (T,BH): layers, last
_OFF_U = _OFF_SH + (NUM_LAYERS + 1) * SEQ_LEN     # u vectors, L+1 rows padded to 8-row block
_U_ROWS = NUM_LAYERS + 1 + ((-(NUM_LAYERS + 1)) % 8)
_PAR_ROWS = _OFF_U + _U_ROWS                      # 320

_OFF_DW = 0                                       # (BH, B*NPAD) block-diag tied decoder weight
_OFF_DB = BH                                      # (T, B*NPAD) bias table (extra-BN shift folded)
_DEC_ROWS = _OFF_DB + SEQ_LEN                     # 72


# =============================== fused Pallas kernel =========================

def _fused_forward_kernel(tok_ref, h0_ref, par_ref, dec_ref, seq_ref, hid_ref):
    """Entire stackedIndRNN_encoder eval forward, everything resident in VMEM.

    Packed layout: activation a[t, b, c] lives at packed[t, b*C + c]
    (batch in lanes), so each timestep of the serial recurrence is one
    aligned sublane row and the per-layer matmuls use block-diagonal weights.
    """
    f32 = jnp.float32

    # ---- embedding gather as a one-hot matmul, folded into layer-0 W --------
    tok = tok_ref[...]                                             # (T, B) int32
    cls = lax.broadcasted_iota(jnp.int32, (SEQ_LEN, OUTPUTCLASS), 1)
    onehot = jnp.concatenate(
        [(cls == tok[:, b:b + 1]).astype(f32) for b in range(BATCH)],
        axis=1)                                                    # (T, B*C) = (8,128)
    w0 = par_ref[_OFF_W0:_OFF_W0 + BATCH * OUTPUTCLASS, :]         # (B*C, BH)
    pre = jnp.dot(onehot, w0, preferred_element_type=f32)          # (T, BH)
    # dropout_embedding / dropout_words: identity in eval mode.

    u_blk = par_ref[_OFF_U:_OFF_U + _U_ROWS, :]                    # (8, BH)
    h0_all = h0_ref[...]                                           # (L+1, BH)

    def sc(i):
        r = _OFF_SC + i * SEQ_LEN
        return par_ref[r:r + SEQ_LEN, :]

    def sh(i):
        r = _OFF_SH + i * SEQ_LEN
        return par_ref[r:r + SEQ_LEN, :]

    def indrnn(xn, u, h):
        # h_t = relu(xn_t + u * h_{t-1}); BN(+bias) already folded into xn.
        rows = []
        for t in range(SEQ_LEN):                                   # statically unrolled
            h = jnp.maximum(xn[t:t + 1, :] + u * h, 0.0)
            rows.append(h)
        return jnp.concatenate(rows, axis=0), h                    # ((T,BH), (1,BH))

    # ---- stacked IndRNN layers, then last_fc + last IndRNN (E == H) ---------
    hid_rows = []
    x = None
    for l in range(NUM_LAYERS + 1):
        if l > 0:
            r = _OFF_WMID + (l - 1) * BH
            pre = jnp.dot(x, par_ref[r:r + BH, :], preferred_element_type=f32)
        xn = pre * sc(l) + sh(l)                  # per-timestep BN (+ Linear bias)
        x, h = indrnn(xn, u_blk[l:l + 1, :], h0_all[l:l + 1, :])
        hid_rows.append(h)
        # dropout_overtime / dropout_last: identity in eval mode.

    hid_ref[...] = jnp.concatenate(hid_rows, axis=0)               # (L+1, BH)

    # ---- extra BN (scale only; shift pre-folded into bias table) + decoder --
    xs = x * sc(NUM_LAYERS + 1)
    # dropout_extrafc: identity in eval mode.
    dw = dec_ref[_OFF_DW:_OFF_DW + BH, :]                          # (BH, B*NPAD)
    db = dec_ref[_OFF_DB:_OFF_DB + SEQ_LEN, :]                     # (T,  B*NPAD)
    seq_ref[...] = jnp.dot(xs, dw, preferred_element_type=f32) + db


# =============================== host-side packing ===========================

def prepare_params(params):
    """One-time packing of all parameter-only preprocessing.

    Runs outside the per-step jit: BN eval folding (with the preceding Linear
    bias), lane packing (batch-in-lanes), block-diagonal weights, the
    embedding ⊗ layer-0 fold, decoder lane padding, and the extra-BN-shift /
    decoder-bias fold.
    """
    HI = lax.Precision.HIGHEST
    f32 = jnp.float32
    eye = jnp.eye(BATCH, dtype=f32)

    def bdiag(w):                         # (din, dout) -> (B*din, B*dout)
        return jnp.kron(eye, w.astype(f32))

    def lanes(a):                         # (R, C) -> (R, B*C), same values per batch block
        return jnp.tile(a.astype(f32), (1, BATCH))

    def bn_affine(prefix, bias):
        # eval BN folded with preceding Linear bias:
        #   xn = (x@W)*scale_t + (beta + (bias - rmean_t)*scale_t)
        scale = params[f"{prefix}_gamma"] * lax.rsqrt(params[f"{prefix}_rvar"] + EPS)
        shift = params[f"{prefix}_beta"] + (bias - params[f"{prefix}_rmean"]) * scale
        return scale, shift               # each (T, H)

    rows = []
    # layer 0: embedding table constant-folded into the first Linear_overtime.
    enc_w0 = jnp.dot(params["encoder"], params["di0_w"], precision=HI)   # (C, H)
    rows.append(bdiag(enc_w0))
    for l in range(1, NUM_LAYERS):
        rows.append(bdiag(params[f"di{l}_w"]))
    rows.append(bdiag(params["last_fc_w"]))

    scales, shifts = [], []
    for l in range(NUM_LAYERS):
        s, t = bn_affine(f"rnn{l}", params[f"di{l}_b"])
        scales.append(lanes(s)); shifts.append(lanes(t))
    s, t = bn_affine("last", params["last_fc_b"])
    scales.append(lanes(s)); shifts.append(lanes(t))
    ex_scale, ex_shift = bn_affine("extra", jnp.zeros((EMBED_SIZE,), f32))
    scales.append(lanes(ex_scale))
    rows += scales + shifts

    us = [params[f"rnn{l}_u"] for l in range(NUM_LAYERS)] + [params["last_u"]]
    u_blk = jnp.concatenate([lanes(u[None, :]) for u in us], axis=0)      # (L+1, BH)
    rows.append(jnp.pad(u_blk, ((0, _U_ROWS - u_blk.shape[0]), (0, 0))))

    par = jnp.concatenate(rows, axis=0)
    assert par.shape == (_PAR_ROWS, BH), par.shape

    # decoder: weight tied to the encoder (snapshot; eval), lane-padded to NPAD,
    # block-diagonal over batch; extra-BN shift + decoder bias folded into a
    # per-(t, class) bias table so the kernel tail is one matmul + one add.
    dec_w = jnp.zeros((EMBED_SIZE, NPAD), f32).at[:, :OUTPUTCLASS].set(
        params["encoder"].T)
    dec_b = jnp.zeros((NPAD,), f32).at[:OUTPUTCLASS].set(params["dec_b"])
    bias_tab = jnp.dot(ex_shift, dec_w, precision=HI) + dec_b[None, :]    # (T, NPAD)
    dec = jnp.concatenate([bdiag(dec_w), lanes(bias_tab)], axis=0)
    assert dec.shape == (_DEC_ROWS, BNPAD), dec.shape

    return {"par": par, "dec": dec}


# =============================== parameters ==================================

def _kaiming_uniform(key, fan_in, fan_out, a=8.0):
    # nn.init.kaiming_uniform_(param, a=8, mode='fan_in'); weight stored (K, N).
    gain = (2.0 / (1.0 + a * a)) ** 0.5
    bound = gain * (3.0 / fan_in) ** 0.5
    return jax.random.uniform(key, (fan_in, fan_out), jnp.float32, -bound, bound)


def init_params(key):
    keys = iter(jax.random.split(key, 8 * (NUM_LAYERS + 4)))
    p = {}
    # encoder (and weight-tied decoder): uniform(-0.01, 0.01)
    p["encoder"] = jax.random.uniform(
        next(keys), (OUTPUTCLASS, EMBED_SIZE), jnp.float32, -0.01, 0.01)
    for l in range(NUM_LAYERS):
        din = EMBED_SIZE if l == 0 else HIDDEN_SIZE
        p[f"di{l}_w"] = _kaiming_uniform(next(keys), din, HIDDEN_SIZE)
        p[f"di{l}_b"] = jnp.zeros((HIDDEN_SIZE,), jnp.float32)
        p[f"rnn{l}_u"] = jax.random.uniform(
            next(keys), (HIDDEN_SIZE,), jnp.float32, 0.0, U_BOUND)
        p[f"rnn{l}_gamma"] = jnp.ones((HIDDEN_SIZE,), jnp.float32)
        p[f"rnn{l}_beta"] = jnp.zeros((HIDDEN_SIZE,), jnp.float32)
        p[f"rnn{l}_rmean"] = jnp.zeros((SEQ_LEN, HIDDEN_SIZE), jnp.float32)
        p[f"rnn{l}_rvar"] = jnp.ones((SEQ_LEN, HIDDEN_SIZE), jnp.float32)
    p["last_fc_w"] = _kaiming_uniform(next(keys), HIDDEN_SIZE, EMBED_SIZE)
    p["last_fc_b"] = jnp.zeros((EMBED_SIZE,), jnp.float32)
    p["last_u"] = jax.random.uniform(
        next(keys), (EMBED_SIZE,), jnp.float32, 0.0, U_BOUND)
    p["last_gamma"] = jnp.ones((EMBED_SIZE,), jnp.float32)
    p["last_beta"] = jnp.zeros((EMBED_SIZE,), jnp.float32)
    p["last_rmean"] = jnp.zeros((SEQ_LEN, EMBED_SIZE), jnp.float32)
    p["last_rvar"] = jnp.ones((SEQ_LEN, EMBED_SIZE), jnp.float32)
    p["extra_gamma"] = jnp.ones((EMBED_SIZE,), jnp.float32)
    p["extra_beta"] = jnp.zeros((EMBED_SIZE,), jnp.float32)
    p["extra_rmean"] = jnp.zeros((SEQ_LEN, EMBED_SIZE), jnp.float32)
    p["extra_rvar"] = jnp.ones((SEQ_LEN, EMBED_SIZE), jnp.float32)
    p["dec_b"] = jnp.zeros((OUTPUTCLASS,), jnp.float32)
    return p


# =============================== forward =====================================

@jax.jit
def stacked_indrnn_forward(packed, tokens, hidden_input_all):
    """tokens: (T, B) int ids; hidden_input_all: dict of (B, H)/(B, E) states."""
    assert tokens.shape == (SEQ_LEN, BATCH)
    tok = tokens.astype(jnp.int32)
    h0 = jnp.concatenate(
        [hidden_input_all[f"hidden{l}"].reshape(1, BH) for l in range(NUM_LAYERS)]
        + [hidden_input_all["hidden_lastindrnn"].reshape(1, BATCH * EMBED_SIZE)],
        axis=0).astype(jnp.float32)                                # (L+1, BH)

    seq_out, hid_out = pl.pallas_call(
        _fused_forward_kernel,
        out_shape=(jax.ShapeDtypeStruct((SEQ_LEN, BNPAD), jnp.float32),
                   jax.ShapeDtypeStruct((NUM_LAYERS + 1, BH), jnp.float32)),
        grid_spec=pltpu.PrefetchScalarGridSpec(
            num_scalar_prefetch=0,
            grid=(1,),
            in_specs=[
                pl.BlockSpec((SEQ_LEN, BATCH), lambda i: (0, 0)),          # tokens
                pl.BlockSpec((NUM_LAYERS + 1, BH), lambda i: (0, 0)),      # h0 pack
                pl.BlockSpec((_PAR_ROWS, BH), lambda i: (0, 0)),           # param slab
                pl.BlockSpec((_DEC_ROWS, BNPAD), lambda i: (0, 0)),        # decoder slab
            ],
            out_specs=(
                pl.BlockSpec((SEQ_LEN, BNPAD), lambda i: (0, 0)),          # packed logits
                pl.BlockSpec((NUM_LAYERS + 1, BH), lambda i: (0, 0)),      # packed hiddens
            ),
        ),
        compiler_params=pltpu.CompilerParams(
            dimension_semantics=("arbitrary",)),
    )(tok, h0, packed["par"], packed["dec"])

    # packed (T, B*NPAD) row-major reshape -> (T*B, NPAD) matches view(T*B, -1).
    logits = seq_out.reshape(TB, NPAD)[:, :OUTPUTCLASS]
    hidden_out = {f"hidden{l}": hid_out[l].reshape(BATCH, HIDDEN_SIZE)
                  for l in range(NUM_LAYERS)}
    hidden_out["hidden_lastindrnn"] = hid_out[NUM_LAYERS].reshape(BATCH, EMBED_SIZE)
    return logits, hidden_out


# =============================== pure-JAX reference ==========================

def reference_forward(params, tokens, hidden):
    """Eval-mode reference of stackedIndRNN_encoder.forward (bn_before, tied)."""
    HI = lax.Precision.HIGHEST
    T, B = tokens.shape
    x = params["encoder"][tokens.reshape(T * B)]                   # (TB, E)

    def bn_aff(prefix, bias):
        sc = params[f"{prefix}_gamma"] * lax.rsqrt(params[f"{prefix}_rvar"] + EPS)
        sh = params[f"{prefix}_beta"] + (bias - params[f"{prefix}_rmean"]) * sc
        return sc, sh

    def layer(x, w, sc, sh, u, h):
        pre = jnp.dot(x, w, precision=HI).reshape(T, B, -1)
        xn = pre * sc[:, None, :] + sh[:, None, :]
        outs = []
        for t in range(T):
            h = jnp.maximum(xn[t] + u[None, :] * h, 0.0)
            outs.append(h)
        return jnp.stack(outs, 0).reshape(T * B, -1), h

    hid = {}
    for l in range(NUM_LAYERS):
        sc, sh = bn_aff(f"rnn{l}", params[f"di{l}_b"])
        x, h = layer(x, params[f"di{l}_w"], sc, sh,
                     params[f"rnn{l}_u"], hidden[f"hidden{l}"])
        hid[f"hidden{l}"] = h
    sc, sh = bn_aff("last", params["last_fc_b"])
    x, h = layer(x, params["last_fc_w"], sc, sh,
                 params["last_u"], hidden["hidden_lastindrnn"])
    hid["hidden_lastindrnn"] = h
    sc, sh = bn_aff("extra", jnp.zeros((EMBED_SIZE,), jnp.float32))
    x = (x.reshape(T, B, -1) * sc[:, None, :] + sh[:, None, :]).reshape(T * B, -1)
    logits = jnp.dot(x, params["encoder"].T, precision=HI) + params["dec_b"]
    return logits, hid


# =============================== main ========================================

if __name__ == "__main__":
    key = jax.random.PRNGKey(0)
    pkey, tkey, skey, hkey = jax.random.split(key, 4)
    params = init_params(pkey)

    # Give BN running stats / biases / initial hiddens non-trivial values so the
    # self-test exercises the per-timestep BN folding and the packed layouts.
    rk = iter(jax.random.split(skey, 6 * NUM_LAYERS + 16))
    for l in range(NUM_LAYERS):
        params[f"rnn{l}_rmean"] = 0.01 * jax.random.normal(next(rk), (SEQ_LEN, HIDDEN_SIZE))
        params[f"rnn{l}_rvar"] = jax.random.uniform(next(rk), (SEQ_LEN, HIDDEN_SIZE),
                                                    minval=0.5, maxval=1.5)
        params[f"rnn{l}_gamma"] = jax.random.uniform(next(rk), (HIDDEN_SIZE,),
                                                     minval=0.5, maxval=1.5)
        params[f"rnn{l}_beta"] = 0.01 * jax.random.normal(next(rk), (HIDDEN_SIZE,))
        params[f"di{l}_b"] = 0.01 * jax.random.normal(next(rk), (HIDDEN_SIZE,))
    for name in ("last", "extra"):
        params[f"{name}_rmean"] = 0.01 * jax.random.normal(next(rk), (SEQ_LEN, EMBED_SIZE))
        params[f"{name}_rvar"] = jax.random.uniform(next(rk), (SEQ_LEN, EMBED_SIZE),
                                                    minval=0.5, maxval=1.5)
        params[f"{name}_gamma"] = jax.random.uniform(next(rk), (EMBED_SIZE,),
                                                     minval=0.5, maxval=1.5)
        params[f"{name}_beta"] = 0.01 * jax.random.normal(next(rk), (EMBED_SIZE,))
    params["last_fc_b"] = 0.01 * jax.random.normal(next(rk), (EMBED_SIZE,))
    params["dec_b"] = 0.01 * jax.random.normal(next(rk), (OUTPUTCLASS,))

    tokens = jax.random.randint(tkey, (SEQ_LEN, BATCH), 0, OUTPUTCLASS,
                                dtype=jnp.int32)
    hks = jax.random.split(hkey, NUM_LAYERS + 1)
    hidden0 = {f"hidden{l}": 0.01 * jnp.abs(jax.random.normal(hks[l], (BATCH, HIDDEN_SIZE)))
               for l in range(NUM_LAYERS)}
    hidden0["hidden_lastindrnn"] = 0.01 * jnp.abs(
        jax.random.normal(hks[NUM_LAYERS], (BATCH, EMBED_SIZE)))

    packed = prepare_params(params)     # one-time host-side folding / packing

    logits, hidden_out = stacked_indrnn_forward(packed, tokens, hidden0)
    logits = jax.block_until_ready(logits)
    jax.tree_util.tree_map(jax.block_until_ready, hidden_out)

    assert logits.shape == (TB, OUTPUTCLASS)
    assert hidden_out["hidden0"].shape == (BATCH, HIDDEN_SIZE)
    assert hidden_out["hidden_lastindrnn"].shape == (BATCH, EMBED_SIZE)
    assert bool(jnp.all(jnp.isfinite(logits)))

    # Self-check vs. a pure-JAX reference (tolerance covers MXU matmul precision).
    ref_logits, ref_hidden = reference_forward(params, tokens, hidden0)

    def _close(a, b):
        scale = float(jnp.maximum(jnp.max(jnp.abs(b)), 1e-3))
        return float(jnp.max(jnp.abs(a - b))) <= 0.05 * scale

    assert _close(logits, ref_logits)
    for k in ref_hidden:
        assert _close(hidden_out[k], ref_hidden[k])

    print("KERNEL_OK")
</pallas_src>

<mosaic_0001>
module attributes {stable_mosaic.version = 11 : i64} {
  func.func @_fused_forward_kernel(%arg0: i32, %arg1: memref<8x2xi32, #tpu.memory_space<vmem>>, %arg2: memref<3x64xf32, #tpu.memory_space<vmem>>, %arg3: memref<320x64xf32, #tpu.memory_space<vmem>>, %arg4: memref<72x256xf32, #tpu.memory_space<vmem>>, %arg5: memref<8x256xf32, #tpu.memory_space<vmem>>, %arg6: memref<3x64xf32, #tpu.memory_space<vmem>>) attributes {dimension_semantics = [#tpu.dimension_semantics<arbitrary>], iteration_bounds = array<i64: 1>, scalar_prefetch = 0 : i64, scratch_operands = 0 : i64, tpu.core_type = #tpu.core_type<tc>, window_params = [{pipeline_mode = #tpu.pipeline_mode<synchronous>, transform_indices = @transform_0, window_bounds = array<i64: 8, 2>}, {pipeline_mode = #tpu.pipeline_mode<synchronous>, transform_indices = @transform_1, window_bounds = array<i64: 3, 64>}, {pipeline_mode = #tpu.pipeline_mode<synchronous>, transform_indices = @transform_2, window_bounds = array<i64: 320, 64>}, {pipeline_mode = #tpu.pipeline_mode<synchronous>, transform_indices = @transform_3, window_bounds = array<i64: 72, 256>}, {pipeline_mode = #tpu.pipeline_mode<synchronous>, transform_indices = @transform_4, window_bounds = array<i64: 8, 256>}, {pipeline_mode = #tpu.pipeline_mode<synchronous>, transform_indices = @transform_5, window_bounds = array<i64: 3, 64>}]} {
    %c0 = arith.constant 0 : index
    %c0_0 = arith.constant 0 : index
    %0 = vector.load %arg1[%c0, %c0_0] : memref<8x2xi32, #tpu.memory_space<vmem>>, vector<8x2xi32>
    %1 = tpu.iota {dimensions = array<i32: 1>} : vector<8x64xi32>
    %2 = vector.extract_strided_slice %0 {offsets = [0, 0], sizes = [8, 1], strides = [1, 1]} : vector<8x2xi32> to vector<8x1xi32>
    %3 = vector.broadcast %2 : vector<8x1xi32> to vector<8x64xi32>
    %4 = arith.cmpi eq, %1, %3 : vector<8x64xi32>
    %5 = arith.extui %4 : vector<8x64xi1> to vector<8x64xi32>
    %6 = arith.sitofp %5 : vector<8x64xi32> to vector<8x64xf32>
    %7 = vector.extract_strided_slice %0 {offsets = [0, 1], sizes = [8, 1], strides = [1, 1]} : vector<8x2xi32> to vector<8x1xi32>
    %8 = vector.broadcast %7 : vector<8x1xi32> to vector<8x64xi32>
    %9 = arith.cmpi eq, %1, %8 : vector<8x64xi32>
    %10 = arith.extui %9 : vector<8x64xi1> to vector<8x64xi32>
    %11 = arith.sitofp %10 : vector<8x64xi32> to vector<8x64xf32>
    %12 = tpu.concatenate %6, %11 in 1 : vector<8x64xf32>, vector<8x64xf32> -> vector<8x128xf32>
    %c0_1 = arith.constant 0 : index
    %c0_2 = arith.constant 0 : index
    %13 = vector.load %arg3[%c0_1, %c0_2] : memref<320x64xf32, #tpu.memory_space<vmem>>, vector<128x64xf32>
    %cst = arith.constant dense<0.000000e+00> : vector<8x64xf32>
    %14 = tpu.matmul %12, %13, %cst {dimension_numbers = #tpu.dot_dimension_numbers<[1], [0], [0], [1], [0, 0, 1, 1], [], []>} : vector<8x128xf32>, vector<128x64xf32>, vector<8x64xf32> -> vector<8x64xf32>
    %c312 = arith.constant 312 : index
    %c0_3 = arith.constant 0 : index
    %15 = vector.load %arg3[%c312, %c0_3] : memref<320x64xf32, #tpu.memory_space<vmem>>, vector<8x64xf32>
    %c0_4 = arith.constant 0 : index
    %c0_5 = arith.constant 0 : index
    %16 = vector.load %arg2[%c0_4, %c0_5] : memref<3x64xf32, #tpu.memory_space<vmem>>, vector<3x64xf32>
    %c256 = arith.constant 256 : index
    %c0_6 = arith.constant 0 : index
    %17 = vector.load %arg3[%c256, %c0_6] : memref<320x64xf32, #tpu.memory_space<vmem>>, vector<8x64xf32>
    %18 = arith.mulf %14, %17 : vector<8x64xf32>
    %c288 = arith.constant 288 : index
    %c0_7 = arith.constant 0 : index
    %19 = vector.load %arg3[%c288, %c0_7] : memref<320x64xf32, #tpu.memory_space<vmem>>, vector<8x64xf32>
    %20 = arith.addf %18, %19 : vector<8x64xf32>
    %21 = vector.extract_strided_slice %15 {offsets = [0, 0], sizes = [1, 64], strides = [1, 1]} : vector<8x64xf32> to vector<1x64xf32>
    %22 = vector.extract_strided_slice %16 {offsets = [0, 0], sizes = [1, 64], strides = [1, 1]} : vector<3x64xf32> to vector<1x64xf32>
    %23 = vector.extract_strided_slice %20 {offsets = [0, 0], sizes = [1, 64], strides = [1, 1]} : vector<8x64xf32> to vector<1x64xf32>
    %24 = arith.mulf %21, %22 : vector<1x64xf32>
    %25 = arith.addf %23, %24 : vector<1x64xf32>
    %cst_8 = arith.constant 0.000000e+00 : f32
    %26 = vector.broadcast %cst_8 : f32 to vector<1x64xf32>
    %27 = arith.maximumf %25, %26 : vector<1x64xf32>
    %28 = vector.extract_strided_slice %20 {offsets = [1, 0], sizes = [1, 64], strides = [1, 1]} : vector<8x64xf32> to vector<1x64xf32>
    %29 = arith.mulf %21, %27 : vector<1x64xf32>
    %30 = arith.addf %28, %29 : vector<1x64xf32>
    %cst_9 = arith.constant 0.000000e+00 : f32
    %31 = vector.broadcast %cst_9 : f32 to vector<1x64xf32>
    %32 = arith.maximumf %30, %31 : vector<1x64xf32>
    %33 = vector.extract_strided_slice %20 {offsets = [2, 0], sizes = [1, 64], strides = [1, 1]} : vector<8x64xf32> to vector<1x64xf32>
    %34 = arith.mulf %21, %32 : vector<1x64xf32>
    %35 = arith.addf %33, %34 : vector<1x64xf32>
    %cst_10 = arith.constant 0.000000e+00 : f32
    %36 = vector.broadcast %cst_10 : f32 to vector<1x64xf32>
    %37 = arith.maximumf %35, %36 : vector<1x64xf32>
    %38 = vector.extract_strided_slice %20 {offsets = [3, 0], sizes = [1, 64], strides = [1, 1]} : vector<8x64xf32> to vector<1x64xf32>
    %39 = arith.mulf %21, %37 : vector<1x64xf32>
    %40 = arith.addf %38, %39 : vector<1x64xf32>
    %cst_11 = arith.constant 0.000000e+00 : f32
    %41 = vector.broadcast %cst_11 : f32 to vector<1x64xf32>
    %42 = arith.maximumf %40, %41 : vector<1x64xf32>
    %43 = vector.extract_strided_slice %20 {offsets = [4, 0], sizes = [1, 64], strides = [1, 1]} : vector<8x64xf32> to vector<1x64xf32>
    %44 = arith.mulf %21, %42 : vector<1x64xf32>
    %45 = arith.addf %43, %44 : vector<1x64xf32>
    %cst_12 = arith.constant 0.000000e+00 : f32
    %46 = vector.broadcast %cst_12 : f32 to vector<1x64xf32>
    %47 = arith.maximumf %45, %46 : vector<1x64xf32>
    %48 = vector.extract_strided_slice %20 {offsets = [5, 0], sizes = [1, 64], strides = [1, 1]} : vector<8x64xf32> to vector<1x64xf32>
    %49 = arith.mulf %21, %47 : vector<1x64xf32>
    %50 = arith.addf %48, %49 : vector<1x64xf32>
    %cst_13 = arith.constant 0.000000e+00 : f32
    %51 = vector.broadcast %cst_13 : f32 to vector<1x64xf32>
    %52 = arith.maximumf %50, %51 : vector<1x64xf32>
    %53 = vector.extract_strided_slice %20 {offsets = [6, 0], sizes = [1, 64], strides = [1, 1]} : vector<8x64xf32> to vector<1x64xf32>
    %54 = arith.mulf %21, %52 : vector<1x64xf32>
    %55 = arith.addf %53, %54 : vector<1x64xf32>
    %cst_14 = arith.constant 0.000000e+00 : f32
    %56 = vector.broadcast %cst_14 : f32 to vector<1x64xf32>
    %57 = arith.maximumf %55, %56 : vector<1x64xf32>
    %58 = vector.extract_strided_slice %20 {offsets = [7, 0], sizes = [1, 64], strides = [1, 1]} : vector<8x64xf32> to vector<1x64xf32>
    %59 = arith.mulf %21, %57 : vector<1x64xf32>
    %60 = arith.addf %58, %59 : vector<1x64xf32>
    %cst_15 = arith.constant 0.000000e+00 : f32
    %61 = vector.broadcast %cst_15 : f32 to vector<1x64xf32>
    %62 = arith.maximumf %60, %61 : vector<1x64xf32>
    %63 = tpu.concatenate %27, %32, %37, %42, %47, %52, %57, %62 in 0 : vector<1x64xf32>, vector<1x64xf32>, vector<1x64xf32>, vector<1x64xf32>, vector<1x64xf32>, vector<1x64xf32>, vector<1x64xf32>, vector<1x64xf32> -> vector<8x64xf32>
    %c128 = arith.constant 128 : index
    %c0_16 = arith.constant 0 : index
    %64 = vector.load %arg3[%c128, %c0_16] : memref<320x64xf32, #tpu.memory_space<vmem>>, vector<64x64xf32>
    %cst_17 = arith.constant dense<0.000000e+00> : vector<8x64xf32>
    %65 = tpu.matmul %63, %64, %cst_17 {dimension_numbers = #tpu.dot_dimension_numbers<[1], [0], [0], [1], [0, 0, 1, 1], [], []>} : vector<8x64xf32>, vector<64x64xf32>, vector<8x64xf32> -> vector<8x64xf32>
    %c264 = arith.constant 264 : index
    %c0_18 = arith.constant 0 : index
    %66 = vector.load %arg3[%c264, %c0_18] : memref<320x64xf32, #tpu.memory_space<vmem>>, vector<8x64xf32>
    %67 = arith.mulf %65, %66 : vector<8x64xf32>
    %c296 = arith.constant 296 : index
    %c0_19 = arith.constant 0 : index
    %68 = vector.load %arg3[%c296, %c0_19] : memref<320x64xf32, #tpu.memory_space<vmem>>, vector<8x64xf32>
    %69 = arith.addf %67, %68 : vector<8x64xf32>
    %70 = vector.extract_strided_slice %15 {offsets = [1, 0], sizes = [1, 64], strides = [1, 1]} : vector<8x64xf32> to vector<1x64xf32>
    %71 = vector.extract_strided_slice %16 {offsets = [1, 0], sizes = [1, 64], strides = [1, 1]} : vector<3x64xf32> to vector<1x64xf32>
    %72 = vector.extract_strided_slice %69 {offsets = [0, 0], sizes = [1, 64], strides = [1, 1]} : vector<8x64xf32> to vector<1x64xf32>
    %73 = arith.mulf %70, %71 : vector<1x64xf32>
    %74 = arith.addf %72, %73 : vector<1x64xf32>
    %cst_20 = arith.constant 0.000000e+00 : f32
    %75 = vector.broadcast %cst_20 : f32 to vector<1x64xf32>
    %76 = arith.maximumf %74, %75 : vector<1x64xf32>
    %77 = vector.extract_strided_slice %69 {offsets = [1, 0], sizes = [1, 64], strides = [1, 1]} : vector<8x64xf32> to vector<1x64xf32>
    %78 = arith.mulf %70, %76 : vector<1x64xf32>
    %79 = arith.addf %77, %78 : vector<1x64xf32>
    %cst_21 = arith.constant 0.000000e+00 : f32
    %80 = vector.broadcast %cst_21 : f32 to vector<1x64xf32>
    %81 = arith.maximumf %79, %80 : vector<1x64xf32>
    %82 = vector.extract_strided_slice %69 {offsets = [2, 0], sizes = [1, 64], strides = [1, 1]} : vector<8x64xf32> to vector<1x64xf32>
    %83 = arith.mulf %70, %81 : vector<1x64xf32>
    %84 = arith.addf %82, %83 : vector<1x64xf32>
    %cst_22 = arith.constant 0.000000e+00 : f32
    %85 = vector.broadcast %cst_22 : f32 to vector<1x64xf32>
    %86 = arith.maximumf %84, %85 : vector<1x64xf32>
    %87 = vector.extract_strided_slice %69 {offsets = [3, 0], sizes = [1, 64], strides = [1, 1]} : vector<8x64xf32> to vector<1x64xf32>
    %88 = arith.mulf %70, %86 : vector<1x64xf32>
    %89 = arith.addf %87, %88 : vector<1x64xf32>
    %cst_23 = arith.constant 0.000000e+00 : f32
    %90 = vector.broadcast %cst_23 : f32 to vector<1x64xf32>
    %91 = arith.maximumf %89, %90 : vector<1x64xf32>
    %92 = vector.extract_strided_slice %69 {offsets = [4, 0], sizes = [1, 64], strides = [1, 1]} : vector<8x64xf32> to vector<1x64xf32>
    %93 = arith.mulf %70, %91 : vector<1x64xf32>
    %94 = arith.addf %92, %93 : vector<1x64xf32>
    %cst_24 = arith.constant 0.000000e+00 : f32
    %95 = vector.broadcast %cst_24 : f32 to vector<1x64xf32>
    %96 = arith.maximumf %94, %95 : vector<1x64xf32>
    %97 = vector.extract_strided_slice %69 {offsets = [5, 0], sizes = [1, 64], strides = [1, 1]} : vector<8x64xf32> to vector<1x64xf32>
    %98 = arith.mulf %70, %96 : vector<1x64xf32>
    %99 = arith.addf %97, %98 : vector<1x64xf32>
    %cst_25 = arith.constant 0.000000e+00 : f32
    %100 = vector.broadcast %cst_25 : f32 to vector<1x64xf32>
    %101 = arith.maximumf %99, %100 : vector<1x64xf32>
    %102 = vector.extract_strided_slice %69 {offsets = [6, 0], sizes = [1, 64], strides = [1, 1]} : vector<8x64xf32> to vector<1x64xf32>
    %103 = arith.mulf %70, %101 : vector<1x64xf32>
    %104 = arith.addf %102, %103 : vector<1x64xf32>
    %cst_26 = arith.constant 0.000000e+00 : f32
    %105 = vector.broadcast %cst_26 : f32 to vector<1x64xf32>
    %106 = arith.maximumf %104, %105 : vector<1x64xf32>
    %107 = vector.extract_strided_slice %69 {offsets = [7, 0], sizes = [1, 64], strides = [1, 1]} : vector<8x64xf32> to vector<1x64xf32>
    %108 = arith.mulf %70, %106 : vector<1x64xf32>
    %109 = arith.addf %107, %108 : vector<1x64xf32>
    %cst_27 = arith.constant 0.000000e+00 : f32
    %110 = vector.broadcast %cst_27 : f32 to vector<1x64xf32>
    %111 = arith.maximumf %109, %110 : vector<1x64xf32>
    %112 = tpu.concatenate %76, %81, %86, %91, %96, %101, %106, %111 in 0 : vector<1x64xf32>, vector<1x64xf32>, vector<1x64xf32>, vector<1x64xf32>, vector<1x64xf32>, vector<1x64xf32>, vector<1x64xf32>, vector<1x64xf32> -> vector<8x64xf32>
    %c192 = arith.constant 192 : index
    %c0_28 = arith.constant 0 : index
    %113 = vector.load %arg3[%c192, %c0_28] : memref<320x64xf32, #tpu.memory_space<vmem>>, vector<64x64xf32>
    %cst_29 = arith.constant dense<0.000000e+00> : vector<8x64xf32>
    %114 = tpu.matmul %112, %113, %cst_29 {dimension_numbers = #tpu.dot_dimension_numbers<[1], [0], [0], [1], [0, 0, 1, 1], [], []>} : vector<8x64xf32>, vector<64x64xf32>, vector<8x64xf32> -> vector<8x64xf32>
    %c272 = arith.constant 272 : index
    %c0_30 = arith.constant 0 : index
    %115 = vector.load %arg3[%c272, %c0_30] : memref<320x64xf32, #tpu.memory_space<vmem>>, vector<8x64xf32>
    %116 = arith.mulf %114, %115 : vector<8x64xf32>
    %c304 = arith.constant 304 : index
    %c0_31 = arith.constant 0 : index
    %117 = vector.load %arg3[%c304, %c0_31] : memref<320x64xf32, #tpu.memory_space<vmem>>, vector<8x64xf32>
    %118 = arith.addf %116, %117 : vector<8x64xf32>
    %119 = vector.extract_strided_slice %15 {offsets = [2, 0], sizes = [1, 64], strides = [1, 1]} : vector<8x64xf32> to vector<1x64xf32>
    %120 = vector.extract_strided_slice %16 {offsets = [2, 0], sizes = [1, 64], strides = [1, 1]} : vector<3x64xf32> to vector<1x64xf32>
    %121 = vector.extract_strided_slice %118 {offsets = [0, 0], sizes = [1, 64], strides = [1, 1]} : vector<8x64xf32> to vector<1x64xf32>
    %122 = arith.mulf %119, %120 : vector<1x64xf32>
    %123 = arith.addf %121, %122 : vector<1x64xf32>
    %cst_32 = arith.constant 0.000000e+00 : f32
    %124 = vector.broadcast %cst_32 : f32 to vector<1x64xf32>
    %125 = arith.maximumf %123, %124 : vector<1x64xf32>
    %126 = vector.extract_strided_slice %118 {offsets = [1, 0], sizes = [1, 64], strides = [1, 1]} : vector<8x64xf32> to vector<1x64xf32>
    %127 = arith.mulf %119, %125 : vector<1x64xf32>
    %128 = arith.addf %126, %127 : vector<1x64xf32>
    %cst_33 = arith.constant 0.000000e+00 : f32
    %129 = vector.broadcast %cst_33 : f32 to vector<1x64xf32>
    %130 = arith.maximumf %128, %129 : vector<1x64xf32>
    %131 = vector.extract_strided_slice %118 {offsets = [2, 0], sizes = [1, 64], strides = [1, 1]} : vector<8x64xf32> to vector<1x64xf32>
    %132 = arith.mulf %119, %130 : vector<1x64xf32>
    %133 = arith.addf %131, %132 : vector<1x64xf32>
    %cst_34 = arith.constant 0.000000e+00 : f32
    %134 = vector.broadcast %cst_34 : f32 to vector<1x64xf32>
    %135 = arith.maximumf %133, %134 : vector<1x64xf32>
    %136 = vector.extract_strided_slice %118 {offsets = [3, 0], sizes = [1, 64], strides = [1, 1]} : vector<8x64xf32> to vector<1x64xf32>
    %137 = arith.mulf %119, %135 : vector<1x64xf32>
    %138 = arith.addf %136, %137 : vector<1x64xf32>
    %cst_35 = arith.constant 0.000000e+00 : f32
    %139 = vector.broadcast %cst_35 : f32 to vector<1x64xf32>
    %140 = arith.maximumf %138, %139 : vector<1x64xf32>
    %141 = vector.extract_strided_slice %118 {offsets = [4, 0], sizes = [1, 64], strides = [1, 1]} : vector<8x64xf32> to vector<1x64xf32>
    %142 = arith.mulf %119, %140 : vector<1x64xf32>
    %143 = arith.addf %141, %142 : vector<1x64xf32>
    %cst_36 = arith.constant 0.000000e+00 : f32
    %144 = vector.broadcast %cst_36 : f32 to vector<1x64xf32>
    %145 = arith.maximumf %143, %144 : vector<1x64xf32>
    %146 = vector.extract_strided_slice %118 {offsets = [5, 0], sizes = [1, 64], strides = [1, 1]} : vector<8x64xf32> to vector<1x64xf32>
    %147 = arith.mulf %119, %145 : vector<1x64xf32>
    %148 = arith.addf %146, %147 : vector<1x64xf32>
    %cst_37 = arith.constant 0.000000e+00 : f32
    %149 = vector.broadcast %cst_37 : f32 to vector<1x64xf32>
    %150 = arith.maximumf %148, %149 : vector<1x64xf32>
    %151 = vector.extract_strided_slice %118 {offsets = [6, 0], sizes = [1, 64], strides = [1, 1]} : vector<8x64xf32> to vector<1x64xf32>
    %152 = arith.mulf %119, %150 : vector<1x64xf32>
    %153 = arith.addf %151, %152 : vector<1x64xf32>
    %cst_38 = arith.constant 0.000000e+00 : f32
    %154 = vector.broadcast %cst_38 : f32 to vector<1x64xf32>
    %155 = arith.maximumf %153, %154 : vector<1x64xf32>
    %156 = vector.extract_strided_slice %118 {offsets = [7, 0], sizes = [1, 64], strides = [1, 1]} : vector<8x64xf32> to vector<1x64xf32>
    %157 = arith.mulf %119, %155 : vector<1x64xf32>
    %158 = arith.addf %156, %157 : vector<1x64xf32>
    %cst_39 = arith.constant 0.000000e+00 : f32
    %159 = vector.broadcast %cst_39 : f32 to vector<1x64xf32>
    %160 = arith.maximumf %158, %159 : vector<1x64xf32>
    %161 = tpu.concatenate %125, %130, %135, %140, %145, %150, %155, %160 in 0 : vector<1x64xf32>, vector<1x64xf32>, vector<1x64xf32>, vector<1x64xf32>, vector<1x64xf32>, vector<1x64xf32>, vector<1x64xf32>, vector<1x64xf32> -> vector<8x64xf32>
    %162 = tpu.concatenate %62, %111, %160 in 0 : vector<1x64xf32>, vector<1x64xf32>, vector<1x64xf32> -> vector<3x64xf32>
    %c0_40 = arith.constant 0 : index
    %c0_41 = arith.constant 0 : index
    %163 = vector.load %arg6[%c0_40, %c0_41] : memref<3x64xf32, #tpu.memory_space<vmem>>, vector<3x64xf32>
    tpu.vector_store %arg6[%c0_40, %c0_41], %162 {strides = array<i32>} : memref<3x64xf32, #tpu.memory_space<vmem>>, vector<3x64xf32>,
    %c280 = arith.constant 280 : index
    %c0_42 = arith.constant 0 : index
    %164 = vector.load %arg3[%c280, %c0_42] : memref<320x64xf32, #tpu.memory_space<vmem>>, vector<8x64xf32>
    %165 = arith.mulf %161, %164 : vector<8x64xf32>
    %c0_43 = arith.constant 0 : index
    %c0_44 = arith.constant 0 : index
    %166 = vector.load %arg4[%c0_43, %c0_44] : memref<72x256xf32, #tpu.memory_space<vmem>>, vector<64x256xf32>
    %c64 = arith.constant 64 : index
    %c0_45 = arith.constant 0 : index
    %167 = vector.load %arg4[%c64, %c0_45] : memref<72x256xf32, #tpu.memory_space<vmem>>, vector<8x256xf32>
    %cst_46 = arith.constant dense<0.000000e+00> : vector<8x256xf32>
    %168 = tpu.matmul %165, %166, %cst_46 {dimension_numbers = #tpu.dot_dimension_numbers<[1], [0], [0], [1], [0, 0, 1, 1], [], []>} : vector<8x64xf32>, vector<64x256xf32>, vector<8x256xf32> -> vector<8x256xf32>
    %169 = arith.addf %168, %167 : vector<8x256xf32>
    %c0_47 = arith.constant 0 : index
    %c0_48 = arith.constant 0 : index
    %170 = vector.load %arg5[%c0_47, %c0_48] : memref<8x256xf32, #tpu.memory_space<vmem>>, vector<8x256xf32>
    tpu.vector_store %arg5[%c0_47, %c0_48], %169 {strides = array<i32>} : memref<8x256xf32, #tpu.memory_space<vmem>>, vector<8x256xf32>,
    return
  }
  func.func @transform_0(%arg0: i32) -> (i32, i32) {
    %c0_i32 = arith.constant 0 : i32
    %c0_i32_0 = arith.constant 0 : i32
    %c0_i32_1 = arith.constant 0 : i32
    return %c0_i32, %c0_i32_0 : i32, i32
  }
  func.func @transform_1(%arg0: i32) -> (i32, i32) {
    %c0_i32 = arith.constant 0 : i32
    %c0_i32_0 = arith.constant 0 : i32
    %c0_i32_1 = arith.constant 0 : i32
    return %c0_i32, %c0_i32_0 : i32, i32
  }
  func.func @transform_2(%arg0: i32) -> (i32, i32) {
    %c0_i32 = arith.constant 0 : i32
    %c0_i32_0 = arith.constant 0 : i32
    %c0_i32_1 = arith.constant 0 : i32
    return %c0_i32, %c0_i32_0 : i32, i32
  }
  func.func @transform_3(%arg0: i32) -> (i32, i32) {
    %c0_i32 = arith.constant 0 : i32
    %c0_i32_0 = arith.constant 0 : i32
    %c0_i32_1 = arith.constant 0 : i32
    return %c0_i32, %c0_i32_0 : i32, i32
  }
  func.func @transform_4(%arg0: i32) -> (i32, i32) {
    %c0_i32 = arith.constant 0 : i32
    %c0_i32_0 = arith.constant 0 : i32
    %c0_i32_1 = arith.constant 0 : i32
    return %c0_i32, %c0_i32_0 : i32, i32
  }
  func.func @transform_5(%arg0: i32) -> (i32, i32) {
    %c0_i32 = arith.constant 0 : i32
    %c0_i32_0 = arith.constant 0 : i32
    %c0_i32_1 = arith.constant 0 : i32
    return %c0_i32, %c0_i32_0 : i32, i32
  }
}

</mosaic_0001>

<bundles_post_ra>
// kernel: squeeze.5
= control target key start
LH: loop header
LB: loop body
LE: loop exit
PB: predicated region body
PF: predicated region fallthrough
CT: control target
= control target key end

     0   :  { %s77_s0 = inlined_call_operand.vmem [shape: f32[64], index: 0, kind: input, shape index: {}]   ;;  %s78_s1 = inlined_call_operand.hbm [shape: f32[2,32], index: 1, kind: output, shape index: {}]  }
   0x1   :  { %v6_v0 = vld [vmem:[%s77_s0] sm:$0x1] }
   0x2   :  { %2 = vsyncpa [#allocation1], 0  ;;  %7 = vst [vmem:[#allocation3] sm:$0x1] %v6_v0  ;;  %vm9_vm0 = vcmask 261120   ;;  %s59_s0 = smov 96  }
   0x3   :  { %s60_s8 = smov [#allocation0]  }
   0x4   :  { %s29_s9 = sshll.u32 %s60_s8, 4  ;;  %s30_s9 = int_to_ptr.vmem [resolvable:$true] %s29_s9 }
   0x5   :  { %s37_s10 = scalar_lea.vmem %s30_s9, 32  ;;  %p42_p1 = scmp.lt.s32.totalorder %s30_s9, %s30_s9 }
   0x6   :  { %p38_p0 = scmp.ne.s32.totalorder %s30_s9, %s37_s10  ;;  %p43_p2 = scmp.lt.s32.totalorder %s37_s10, %s37_s10 }
   0x8   :  { %p44_p3 = por %p43_p2, %p42_p1 }
   0x9   :  { %v11_v1 = vld [vmem:[#allocation3] sm:$0x1]  }
   0xa   :  { %v8_v2 = vld [vmem:[#allocation3] sm:$0x1]   ;;  %12 = vrot.lane.b32.xlu0 %v11_v1, %s59_s0  ;;  %p45_p4 = pnand %p44_p3, %p38_p0 }
   0xb   :  { %10 = vst.msk [vmem:[#allocation2] sm:$0x1] %vm9_vm0, %v8_v2  }
  0x7c   :  { %v13_v3 = vpop.permute.xlu0 %12  }
  0x7d   :  { %16 = vst.msk [vmem:[#allocation2 + $0x1] sm:$0x1] %vm9_vm0, %v13_v3  }
  0x84   :  { %v21_v4 = vld [vmem:[#allocation2] sm:$0x3] }
  0x85   :  { %24 = vst [vmem:[#allocation0] sm:$0x3] %v21_v4 }
  0x86   :  { %48 = shalt.err (!%p45_p4)
}
  0x87   :  { %32 = dma.vmem_to_hbm [thread:$0]  %s30_s9, 32, %s78_s1, [#allocation1]  }
  0x88   :  { %57 = dma.done.wait [#allocation1], 32  }
  0x89   :  { %58 = vsyncadd [#allocation1], 4294967264 }
  0x8a   :  { %34 = vsyncpa [#allocation1], 1 }

// kernel: stacked_indrnn_forward.1
= control target key start
LH: loop header
LB: loop body
LE: loop exit
PB: predicated region body
PF: predicated region fallthrough
CT: control target
= control target key end

     0   :  { %v754_v0 = vmov 1   ;;  %v755_v2 = vmov 0.0   ;;  %v756_v7 = vmov 0   ;;  %vm757_vm0 = vmmov 0   ;;  %s1085_s0 = inlined_call_operand.vmem [shape: s32[8,2], index: 0, kind: input, shape index: {}]   ;;  %s1086_s2 = inlined_call_operand.vmem [shape: f32[320,64], index: 2, kind: input, shape index: {}]   ;;  %s1087_s1 = inlined_call_operand.vmem [shape: f32[3,64], index: 1, kind: input, shape index: {}]   ;;  %s1088_s3 = inlined_call_operand.vmem [shape: f32[72,256], index: 3, kind: input, shape index: {}]   ;;  %s1089_s5 = inlined_call_operand.vmem [shape: f32[3,64], index: 5, kind: output, shape index: {1}]   ;;  %s1090_s4 = inlined_call_operand.vmem [shape: f32[8,256], index: 4, kind: output, shape index: {0}]  }
   0x1   :  { %751 = vset.pattern.permute.xlu0 %v754_v0  ;;  %v19_v1 = vld [vmem:[%s1085_s0] sm:$0xff]  ;;  %673 = vmatprep.subr.mxu0 %v755_v2  ;;  %v55_v3 = vld [vmem:[%s1086_s2 + $0x78] sm:$0xff]  ;;  %v54_v4 = vld [vmem:[%s1086_s2 + $0x70] sm:$0xff]  ;;  %v20_v20 = vlaneseq  ;;  %s758_s0 = smov 64   ;;  %vm38_vm3 = vcmask 523264   ;;  %vm195_vm4 = vcmask 1040384  }
   0x2   :  { %29 = vperm.xlu0 %751, %v19_v1   ;;  %674 = vmatpush3.msra.mxu0 %v55_v3  ;;  %v53_v5 = vld [vmem:[%s1086_s2 + $0x68] sm:$0xff]  ;;  %v52_v6 = vld [vmem:[%s1086_s2 + $0x60] sm:$0xff]  ;;  %v51_v8 = vld [vmem:[%s1086_s2 + $0x58] sm:$0xff]  ;;  %vm197_vm5 = vcmask 1041408   ;;  %vm199_vm6 = vcmask 1042432   ;;  %vm201_vm7 = vcmask 1043456  }
   0x3   :  { %675 = vmatprep.subr.mxu0 %v755_v2  ;;  %708 = vmatprep.subr.mxu1 %v755_v2  ;;  %v50_v9 = vld [vmem:[%s1086_s2 + $0x50] sm:$0xff]  ;;  %v49_v10 = vld [vmem:[%s1086_s2 + $0x48] sm:$0xff]  ;;  %v48_v11 = vld [vmem:[%s1086_s2 + $0x40] sm:$0xff]  ;;  %v21_v21 = vand.u32 127, %v20_v20  ;;  %vm203_vm8 = vcmask 1044480   ;;  %vm205_vm9 = vcmask 1045504  }
   0x4   :  { %676 = vmatpush3.msra.mxu0 %v54_v4  ;;  %v47_v12 = vld [vmem:[%s1086_s2 + $0x38] sm:$0xff]  ;;  %v46_v13 = vld [vmem:[%s1086_s2 + $0x30] sm:$0xff]  ;;  %v45_v14 = vld [vmem:[%s1086_s2 + $0x28] sm:$0xff]  ;;  %705 = vmatprep.mubr.msk.f32.mxu0 %vm757_vm0, %v755_v2  ;;  %vm207_vm10 = vcmask 1046528   ;;  %vm527_vm11 = vcmask 518144  }
   0x5   :  { %677 = vmatprep.subr.mxu0 %v755_v2  ;;  %v44_v15 = vld [vmem:[%s1086_s2 + $0x20] sm:$0xff]  ;;  %v43_v16 = vld [vmem:[%s1086_s2 + $0x18] sm:$0xff]  ;;  %v42_v17 = vld [vmem:[%s1086_s2 + $0x10] sm:$0xff]  ;;  %724 = vmatprep.mubr.msk.f32.mxu1 %vm757_vm0, %v755_v2 }
   0x6   :  { %752 = vset.pattern.permute.xlu0 %v756_v7  ;;  %678 = vmatpush3.msra.mxu0 %v53_v5  ;;  %v41_v18 = vld [vmem:[%s1086_s2 + $0x8] sm:$0xff]  ;;  %v40_v19 = vld [vmem:[%s1086_s2] sm:$0xff]  ;;  %v216_v28 = vld [vmem:[%s1086_s2 + $0xb8] sm:$0xff] }
   0x7   :  { %23 = vperm.xlu0 %752, %v19_v1   ;;  %679 = vmatprep.subr.mxu0 %v755_v2  ;;  %v215_v29 = vld [vmem:[%s1086_s2 + $0xb0] sm:$0xff]  ;;  %v214_v30 = vld [vmem:[%s1086_s2 + $0xa8] sm:$0xff]  ;;  %v213_v31 = vld [vmem:[%s1086_s2 + $0xa0] sm:$0xff] }
   0x8   :  { %680 = vmatpush3.msra.mxu0 %v52_v6  ;;  %709 = vmatpush3.msra.mxu1 %v216_v28  ;;  %v212_v32 = vld [vmem:[%s1086_s2 + $0x98] sm:$0xff]  ;;  %v211_v33 = vld [vmem:[%s1086_s2 + $0x90] sm:$0xff]  ;;  %v210_v34 = vld [vmem:[%s1086_s2 + $0x88] sm:$0xff] }
   0x9   :  { %681 = vmatprep.subr.mxu0 %v755_v2  ;;  %710 = vmatprep.subr.mxu1 %v755_v2  ;;  %v209_v35 = vld [vmem:[%s1086_s2 + $0x80] sm:$0xff]  ;;  %v903_v37 = vld [vmem:[%s1086_s2 + $0x138] sm:$0xff] }
   0xa   :  { %682 = vmatpush3.msra.mxu0 %v51_v8  ;;  %711 = vmatpush3.msra.mxu1 %v215_v29  ;;  %v128_v36 = vld [vmem:[%s1086_s2 + $0x100] sm:$0xff]  ;;  %v366_v29 = vld [vmem:[%s1086_s2 + $0xd8] sm:$0xff] }
   0xb   :  { %683 = vmatprep.subr.mxu0 %v755_v2  ;;  %753 = vset.pattern.permute.xlu0 %v754_v0  ;;  %v127_v38 = vld [vmem:[%s1087_s1] sm:$0x7] }
   0xc   :  { %684 = vmatpush3.msra.mxu0 %v50_v9  ;;  %712 = vmatprep.subr.mxu1 %v755_v2  ;;  %v130_v40 = vld [vmem:[%s1086_s2 + $0x120] sm:$0xff]  ;;  %v912_v42 = vmul.f32 %v127_v38, %v903_v37 }
   0xd   :  { %685 = vmatprep.subr.mxu0 %v755_v2  ;;  %713 = vmatpush3.msra.mxu1 %v214_v30  ;;  %v367_v28 = vld [vmem:[%s1086_s2 + $0xe0] sm:$0xff]  ;;  %v365_v30 = vld [vmem:[%s1086_s2 + $0xd0] sm:$0xff] }
   0xe   :  { %686 = vmatpush3.msra.mxu0 %v49_v10  ;;  %714 = vmatprep.subr.mxu1 %v755_v2  ;;  %v295_v38 = vrot.slane %v912_v42, 1 }
   0xf   :  { %687 = vmatprep.subr.mxu0 %v755_v2  ;;  %715 = vmatpush3.msra.mxu1 %v213_v31  ;;  %v364_v31 = vld [vmem:[%s1086_s2 + $0xc8] sm:$0xff] }
  0x10   :  { %688 = vmatpush3.msra.mxu0 %v48_v11  ;;  %716 = vmatprep.subr.mxu1 %v755_v2 }
  0x11   :  { %689 = vmatprep.subr.mxu0 %v755_v2  ;;  %717 = vmatpush3.msra.mxu1 %v212_v32  ;;  %v363_v32 = vld [vmem:[%s1086_s2 + $0xc0] sm:$0xff] }
  0x12   :  { %690 = vmatpush3.msra.mxu0 %v47_v12  ;;  %718 = vmatprep.subr.mxu1 %v755_v2 }
  0x13   :  { %691 = vmatprep.subr.mxu0 %v755_v2  ;;  %719 = vmatpush3.msra.mxu1 %v211_v33  ;;  %v290_v33 = vld [vmem:[%s1086_s2 + $0x108] sm:$0xff] }
  0x14   :  { %692 = vmatpush3.msra.mxu0 %v46_v13  ;;  %720 = vmatprep.subr.mxu1 %v755_v2 }
  0x15   :  { %693 = vmatprep.subr.mxu0 %v755_v2  ;;  %721 = vmatpush3.msra.mxu1 %v210_v34 }
  0x16   :  { %694 = vmatpush3.msra.mxu0 %v45_v14  ;;  %722 = vmatprep.subr.mxu1 %v755_v2 }
  0x17   :  { %695 = vmatprep.subr.mxu0 %v755_v2  ;;  %723 = vmatpush3.msra.mxu1 %v209_v35  ;;  %v292_v35 = vld [vmem:[%s1086_s2 + $0x128] sm:$0xff] }
  0x18   :  { %696 = vmatpush3.msra.mxu0 %v44_v15  ;;  %727 = vmatprep.subr.mxu1 %v755_v2 }
  0x19   :  { %697 = vmatprep.subr.mxu0 %v755_v2 }
  0x1a   :  { %698 = vmatpush3.msra.mxu0 %v43_v16 }
  0x1b   :  { %699 = vmatprep.subr.mxu0 %v755_v2 }
  0x1c   :  { %700 = vmatpush3.msra.mxu0 %v42_v17 }
  0x1d   :  { %701 = vmatprep.subr.mxu0 %v755_v2 }
  0x1e   :  { %702 = vmatpush3.msra.mxu0 %v41_v18 }
  0x1f   :  { %703 = vmatprep.subr.mxu0 %v755_v2 }
  0x20   :  { %704 = vmatpush3.msra.mxu0 %v40_v19 }
  0x7d   :  { %v30_v22 = vpop.permute.xlu0 %29 }
  0x7e   :  { %vm31_vm1 = vcmp.eq.s32.totalorder %v21_v21, %v30_v22 }
  0x7f   :  { %v634_v23 = vsel %vm31_vm1, 1.0, %v755_v2 }
  0x80   :  { %35 = vrot.lane.b32.xlu1 %v634_v23, %s758_s0 }
  0x82   :  { %v24_v24 = vpop.permute.xlu0 %23 }
  0x83   :  { %vm25_vm2 = vcmp.eq.s32.totalorder %v21_v21, %v24_v24 }
  0x84   :  { %v633_v25 = vsel %vm25_vm2, 1.0, %v755_v2 }
  0xf2   :  { %v36_v26 = vpop.permute.xlu1 %35 }
  0xf3   :  { %v39_v27 = vsel %vm38_vm3, %v633_v25, %v36_v26  ;;  %v370_v25 = vld [vmem:[%s1086_s2 + $0xf8] sm:$0xff]  ;;  %v369_v26 = vld [vmem:[%s1086_s2 + $0xf0] sm:$0xff] }
  0xf4   :  { %706 = vmatmul.mubr.f32.vlgmr.msra.gmra.mxu0 %v39_v27  ;;  %v368_v27 = vld [vmem:[%s1086_s2 + $0xe8] sm:$0xff] }
  0xf5   :  { %616 = vmatprep.mubr.f32.mxu0 %v755_v2 }
 0x1b4   :  { %v122_v39 = vpop.f32.mrf.mxu0 }
 0x1b5   :  { %v129_v41 = vmul.f32 %v128_v36, %v122_v39 }
 0x1b6   :  { %v707_v43 = vpop.f32.mrf.mxu0 }
 0x1b7   :  { %v131_v44 = vadd.f32 %v130_v40, %v129_v41 }
 0x1b9   :  { %v133_v45 = vadd.f32 %v912_v42, %v131_v44 }
 0x1bb   :  { %v134_v46 = vmax.f32 %v133_v45, 0.0 }
 0x1bd   :  { %v135_v47 = vmul.f32 %v134_v46, %v903_v37 }
 0x1bf   :  { %v137_v48 = vrot.slane %v135_v47, 7 }
 0x1c1   :  { %v139_v49 = vadd.f32 %v137_v48, %v131_v44 }
 0x1c3   :  { %v140_v50 = vmax.f32 %v139_v49, 0.0 }
 0x1c5   :  { %v142_v51 = vrot.slane %v140_v50, 1  ;;  %v196_v16 = vsel %vm195_vm4, %v134_v46, %v140_v50 }
 0x1c7   :  { %v144_v52 = vmul.f32 %v142_v51, %v903_v37 }
 0x1c9   :  { %v146_v53 = vrot.slane %v144_v52, 6 }
 0x1cb   :  { %v148_v54 = vadd.f32 %v146_v53, %v131_v44 }
 0x1cd   :  { %v149_v55 = vmax.f32 %v148_v54, 0.0 }
 0x1cf   :  { %v151_v56 = vrot.slane %v149_v55, 2  ;;  %v198_v17 = vsel %vm197_vm5, %v196_v16, %v149_v55 }
 0x1d1   :  { %v153_v57 = vmul.f32 %v151_v56, %v903_v37 }
 0x1d3   :  { %v155_v58 = vrot.slane %v153_v57, 5 }
 0x1d5   :  { %v157_v59 = vadd.f32 %v155_v58, %v131_v44 }
 0x1d7   :  { %v158_v60 = vmax.f32 %v157_v59, 0.0 }
 0x1d9   :  { %v160_v61 = vrot.slane %v158_v60, 3  ;;  %v200_v19 = vsel %vm199_vm6, %v198_v17, %v158_v60 }
 0x1db   :  { %v162_v62 = vmul.f32 %v160_v61, %v903_v37 }
 0x1dd   :  { %v164_v63 = vrot.slane %v162_v62, 4 }
 0x1df   :  { %v166_v0 = vadd.f32 %v164_v63, %v131_v44 }
 0x1e1   :  { %v167_v1 = vmax.f32 %v166_v0, 0.0 }
 0x1e3   :  { %v169_v3 = vrot.slane %v167_v1, 4  ;;  %v202_v20 = vsel %vm201_vm7, %v200_v19, %v167_v1 }
 0x1e5   :  { %v171_v4 = vmul.f32 %v169_v3, %v903_v37 }
 0x1e7   :  { %v173_v5 = vrot.slane %v171_v4, 3 }
 0x1e9   :  { %v175_v6 = vadd.f32 %v173_v5, %v131_v44 }
 0x1eb   :  { %v176_v7 = vmax.f32 %v175_v6, 0.0 }
 0x1ed   :  { %v178_v8 = vrot.slane %v176_v7, 5  ;;  %v204_v22 = vsel %vm203_vm8, %v202_v20, %v176_v7 }
 0x1ef   :  { %v180_v9 = vmul.f32 %v178_v8, %v903_v37 }
 0x1f1   :  { %v182_v10 = vrot.slane %v180_v9, 2 }
 0x1f3   :  { %v184_v11 = vadd.f32 %v182_v10, %v131_v44 }
 0x1f5   :  { %v185_v12 = vmax.f32 %v184_v11, 0.0 }
 0x1f7   :  { %v187_v13 = vrot.slane %v185_v12, 6  ;;  %v206_v23 = vsel %vm205_vm9, %v204_v22, %v185_v12 }
 0x1f9   :  { %v189_v14 = vmul.f32 %v187_v13, %v903_v37 }
 0x1fb   :  { %v191_v15 = vrot.slane %v189_v14, 1 }
 0x1fd   :  { %v924_v18 = vadd.f32 %v191_v15, %v131_v44 }
 0x1ff   :  { %v194_v21 = vmax.f32 %v924_v18, 0.0  ;;  %v544_v18 = vld [vmem:[%s1088_s3 + $0x68] sm:$0xff] }
 0x201   :  { %v208_v24 = vsel %vm207_vm10, %v206_v23, %v194_v21  ;;  %v517_v20 = vrot.slane %v194_v21, 7  ;;  %v543_v21 = vld [vmem:[%s1088_s3 + $0x60] sm:$0xff] }
 0x202   :  { %725 = vmatmul.mubr.msk.f32.vlgmr.msra.gmra.mxu1 %vm38_vm3, %v208_v24 }
 0x203   :  { %743 = vmatprep.mubr.msk.f32.mxu1 %vm757_vm0, %v755_v2  ;;  %728 = vmatpush3.msra.mxu1 %v370_v25  ;;  %v546_v25 = vld [vmem:[%s1088_s3 + $0x78] sm:$0xff] }
 0x204   :  { %729 = vmatprep.subr.mxu1 %v755_v2  ;;  %568 = vmatprep.subr.mxu0 %v546_v25 }
 0x205   :  { %730 = vmatpush3.msra.mxu1 %v369_v26  ;;  %v545_v26 = vld [vmem:[%s1088_s3 + $0x70] sm:$0xff] }
 0x206   :  { %731 = vmatprep.subr.mxu1 %v755_v2  ;;  %569 = vmatpush1.msra.mxu0 %v545_v26  ;;  %v529_v26 = vld [vmem:[%s1086_s2 + $0x118] sm:$0xff] }
 0x207   :  { %732 = vmatpush3.msra.mxu1 %v368_v27  ;;  %v542_v27 = vld [vmem:[%s1088_s3 + $0x58] sm:$0xff]  ;;  %570 = vmatprep.subr.mxu0 %v544_v18 }
 0x208   :  { %733 = vmatprep.subr.mxu1 %v755_v2  ;;  %571 = vmatpush1.msra.mxu0 %v543_v21 }
 0x209   :  { %734 = vmatpush3.msra.mxu1 %v367_v28  ;;  %v541_v28 = vld [vmem:[%s1088_s3 + $0x50] sm:$0xff]  ;;  %572 = vmatprep.subr.mxu0 %v542_v27 }
 0x20a   :  { %735 = vmatprep.subr.mxu1 %v755_v2  ;;  %573 = vmatpush1.msra.mxu0 %v541_v28 }
 0x20b   :  { %736 = vmatpush3.msra.mxu1 %v366_v29  ;;  %v540_v29 = vld [vmem:[%s1088_s3 + $0x48] sm:$0xff] }
 0x20c   :  { %737 = vmatprep.subr.mxu1 %v755_v2  ;;  %574 = vmatprep.subr.mxu0 %v540_v29  ;;  %v547_v29 = vld [vmem:[%s1088_s3 + $0x80] sm:$0xff] }
 0x20d   :  { %738 = vmatpush3.msra.mxu1 %v365_v30  ;;  %v539_v30 = vld [vmem:[%s1088_s3 + $0x40] sm:$0xff] }
 0x20e   :  { %739 = vmatprep.subr.mxu1 %v755_v2  ;;  %575 = vmatpush1.msra.mxu0 %v539_v30 }
 0x20f   :  { %740 = vmatpush3.msra.mxu1 %v364_v31  ;;  %v538_v31 = vld [vmem:[%s1088_s3 + $0x38] sm:$0xff] }
 0x210   :  { %741 = vmatprep.subr.mxu1 %v755_v2  ;;  %576 = vmatprep.subr.mxu0 %v538_v31  ;;  %v548_v31 = vld [vmem:[%s1088_s3 + $0x88] sm:$0xff] }
 0x211   :  { %742 = vmatpush3.msra.mxu1 %v363_v32  ;;  %v537_v32 = vld [vmem:[%s1088_s3 + $0x30] sm:$0xff] }
 0x212   :  { %577 = vmatpush1.msra.mxu0 %v537_v32 }
 0x2c2   :  { %v286_v34 = vpop.f32.mrf.mxu1 }
 0x2c3   :  { %v291_v36 = vmul.f32 %v290_v33, %v286_v34  ;;  %v536_v33 = vld [vmem:[%s1088_s3 + $0x28] sm:$0xff]  ;;  %v535_v34 = vld [vmem:[%s1088_s3 + $0x20] sm:$0xff] }
 0x2c4   :  { %v726_v39 = vpop.f32.mrf.mxu1  ;;  %578 = vmatprep.subr.mxu0 %v536_v33 }
 0x2c5   :  { %v293_v40 = vadd.f32 %v292_v35, %v291_v36  ;;  %v534_v35 = vld [vmem:[%s1088_s3 + $0x18] sm:$0xff]  ;;  %v533_v36 = vld [vmem:[%s1088_s3 + $0x10] sm:$0xff]  ;;  %579 = vmatpush1.msra.mxu0 %v535_v34  ;;  %v531_v39 = vld [vmem:[%s1088_s3] sm:$0xff] }
 0x2c6   :  { %580 = vmatprep.subr.mxu0 %v534_v35 }
 0x2c7   :  { %v297_v41 = vadd.f32 %v295_v38, %v293_v40  ;;  %v532_v38 = vld [vmem:[%s1088_s3 + $0x8] sm:$0xff]  ;;  %581 = vmatpush1.msra.mxu0 %v533_v36 }
 0x2c8   :  { %582 = vmatprep.subr.mxu0 %v532_v38 }
 0x2c9   :  { %v298_v43 = vmax.f32 %v297_v41, 0.0  ;;  %583 = vmatpush1.msra.mxu0 %v531_v39 }
 0x2cb   :  { %v300_v44 = vrot.slane %v298_v43, 7 }
 0x2cd   :  { %v302_v2 = vmul.f32 %v300_v44, %v903_v37  ;;  %v448_v44 = vrot.slane %v912_v42, 2 }
 0x2cf   :  { %v303_v45 = vadd.f32 %v302_v2, %v293_v40 }
 0x2d1   :  { %v304_v46 = vmax.f32 %v303_v45, 0.0 }
 0x2d3   :  { %v305_v47 = vmul.f32 %v304_v46, %v903_v37  ;;  %v356_v11 = vsel %vm195_vm4, %v298_v43, %v304_v46  ;;  %v446_v43 = vld [vmem:[%s1086_s2 + $0x130] sm:$0xff] }
 0x2d5   :  { %v307_v48 = vrot.slane %v305_v47, 7 }
 0x2d7   :  { %v309_v49 = vadd.f32 %v307_v48, %v293_v40 }
 0x2d9   :  { %v310_v50 = vmax.f32 %v309_v49, 0.0 }
 0x2db   :  { %v312_v51 = vrot.slane %v310_v50, 1  ;;  %v357_v12 = vsel %vm197_vm5, %v356_v11, %v310_v50 }
 0x2dd   :  { %v314_v52 = vmul.f32 %v312_v51, %v903_v37 }
 0x2df   :  { %v316_v53 = vrot.slane %v314_v52, 6 }
 0x2e1   :  { %v318_v54 = vadd.f32 %v316_v53, %v293_v40 }
 0x2e3   :  { %v319_v55 = vmax.f32 %v318_v54, 0.0 }
 0x2e5   :  { %v321_v56 = vrot.slane %v319_v55, 2  ;;  %v358_v14 = vsel %vm199_vm6, %v357_v12, %v319_v55 }
 0x2e7   :  { %v323_v57 = vmul.f32 %v321_v56, %v903_v37 }
 0x2e9   :  { %v325_v58 = vrot.slane %v323_v57, 5 }
 0x2eb   :  { %v327_v59 = vadd.f32 %v325_v58, %v293_v40 }
 0x2ed   :  { %v328_v60 = vmax.f32 %v327_v59, 0.0 }
 0x2ef   :  { %v330_v61 = vrot.slane %v328_v60, 3  ;;  %v359_v15 = vsel %vm201_vm7, %v358_v14, %v328_v60 }
 0x2f1   :  { %v332_v62 = vmul.f32 %v330_v61, %v903_v37 }
 0x2f3   :  { %v334_v63 = vrot.slane %v332_v62, 4 }
 0x2f5   :  { %v336_v0 = vadd.f32 %v334_v63, %v293_v40 }
 0x2f7   :  { %v337_v1 = vmax.f32 %v336_v0, 0.0 }
 0x2f9   :  { %v339_v3 = vrot.slane %v337_v1, 4  ;;  %v360_v17 = vsel %vm203_vm8, %v359_v15, %v337_v1 }
 0x2fb   :  { %v341_v4 = vmul.f32 %v339_v3, %v903_v37 }
 0x2fd   :  { %v343_v5 = vrot.slane %v341_v4, 3 }
 0x2ff   :  { %v345_v6 = vadd.f32 %v343_v5, %v293_v40 }
 0x301   :  { %v346_v7 = vmax.f32 %v345_v6, 0.0 }
 0x303   :  { %v348_v8 = vrot.slane %v346_v7, 5  ;;  %v361_v19 = vsel %vm205_vm9, %v360_v17, %v346_v7 }
 0x305   :  { %v350_v9 = vmul.f32 %v348_v8, %v903_v37 }
 0x307   :  { %v352_v10 = vrot.slane %v350_v9, 2 }
 0x309   :  { %v354_v13 = vadd.f32 %v352_v10, %v293_v40  ;;  %v444_v40 = vld [vmem:[%s1086_s2 + $0x110] sm:$0xff] }
 0x30b   :  { %v355_v16 = vmax.f32 %v354_v13, 0.0 }
 0x30d   :  { %v362_v22 = vsel %vm207_vm10, %v361_v19, %v355_v16  ;;  %v520_v23 = vrot.slane %v355_v16, 6 }
 0x30e   :  { %744 = vmatmul.mubr.msk.f32.vlgmr.msra.gmra.mxu1 %vm38_vm3, %v362_v22 }
 0x30f   :  { %v993_v24 = vsel %vm195_vm4, %v517_v20, %v520_v23 }
 0x3ce   :  { %v440_v41 = vpop.f32.mrf.mxu1 }
 0x3cf   :  { %v445_v2 = vmul.f32 %v444_v40, %v440_v41 }
 0x3d0   :  { %v745_v45 = vpop.f32.mrf.mxu1 }
 0x3d1   :  { %v447_v46 = vadd.f32 %v446_v43, %v445_v2 }
 0x3d3   :  { %v450_v47 = vadd.f32 %v448_v44, %v447_v46 }
 0x3d5   :  { %v451_v48 = vmax.f32 %v450_v47, 0.0 }
 0x3d7   :  { %v453_v49 = vrot.slane %v451_v48, 6 }
 0x3d9   :  { %v455_v50 = vmul.f32 %v453_v49, %v903_v37 }
 0x3db   :  { %v457_v51 = vrot.slane %v455_v50, 1 }
 0x3dd   :  { %v459_v52 = vadd.f32 %v457_v51, %v447_v46 }
 0x3df   :  { %v460_v53 = vmax.f32 %v459_v52, 0.0 }
 0x3e1   :  { %v462_v54 = vrot.slane %v460_v53, 7  ;;  %v509_v16 = vsel %vm195_vm4, %v451_v48, %v460_v53 }
 0x3e3   :  { %v464_v55 = vmul.f32 %v462_v54, %v903_v37 }
 0x3e5   :  { %v465_v56 = vadd.f32 %v464_v55, %v447_v46 }
 0x3e7   :  { %v466_v57 = vmax.f32 %v465_v56, 0.0 }
 0x3e9   :  { %v467_v58 = vmul.f32 %v466_v57, %v903_v37  ;;  %v510_v17 = vsel %vm197_vm5, %v509_v16, %v466_v57 }
 0x3eb   :  { %v469_v59 = vrot.slane %v467_v58, 7 }
 0x3ed   :  { %v471_v42 = vadd.f32 %v469_v59, %v447_v46 }
 0x3ef   :  { %v472_v60 = vmax.f32 %v471_v42, 0.0 }
 0x3f1   :  { %v474_v61 = vrot.slane %v472_v60, 1  ;;  %v511_v20 = vsel %vm199_vm6, %v510_v17, %v472_v60 }
 0x3f3   :  { %v476_v62 = vmul.f32 %v474_v61, %v903_v37 }
 0x3f5   :  { %v478_v63 = vrot.slane %v476_v62, 6 }
 0x3f7   :  { %v480_v0 = vadd.f32 %v478_v63, %v447_v46 }
 0x3f9   :  { %v481_v1 = vmax.f32 %v480_v0, 0.0 }
 0x3fb   :  { %v483_v3 = vrot.slane %v481_v1, 2  ;;  %v512_v22 = vsel %vm201_vm7, %v511_v20, %v481_v1 }
 0x3fd   :  { %v485_v4 = vmul.f32 %v483_v3, %v903_v37 }
 0x3ff   :  { %v487_v5 = vrot.slane %v485_v4, 5 }
 0x401   :  { %v489_v6 = vadd.f32 %v487_v5, %v447_v46 }
 0x403   :  { %v490_v7 = vmax.f32 %v489_v6, 0.0 }
 0x405   :  { %v492_v8 = vrot.slane %v490_v7, 3  ;;  %v513_v25 = vsel %vm203_vm8, %v512_v22, %v490_v7 }
 0x407   :  { %v494_v9 = vmul.f32 %v492_v8, %v903_v37 }
 0x409   :  { %v496_v10 = vrot.slane %v494_v9, 4 }
 0x40b   :  { %v498_v11 = vadd.f32 %v496_v10, %v447_v46 }
 0x40d   :  { %v499_v12 = vmax.f32 %v498_v11, 0.0 }
 0x40f   :  { %v501_v13 = vrot.slane %v499_v12, 4  ;;  %v514_v18 = vsel %vm205_vm9, %v513_v25, %v499_v12 }
 0x411   :  { %v503_v14 = vmul.f32 %v501_v13, %v903_v37 }
 0x413   :  { %v505_v15 = vrot.slane %v503_v14, 3 }
 0x415   :  { %v507_v19 = vadd.f32 %v505_v15, %v447_v46 }
 0x417   :  { %v508_v23 = vmax.f32 %v507_v19, 0.0 }
 0x419   :  { %v515_v37 = vsel %vm207_vm10, %v514_v18, %v508_v23  ;;  %v523_v21 = vrot.slane %v508_v23, 5 }
 0x41a   :  { %v530_v27 = vmul.f32 %v529_v26, %v515_v37 }
 0x41b   :  { %v526_v28 = vsel %vm197_vm5, %v993_v24, %v523_v21 }
 0x41c   :  { %528 = vst.msk [vmem:[%s1089_s5] sm:$0x7] %vm527_vm11, %v526_v28  ;;  %637 = vmatmul.mubr.msk.f32.vlgmr.msra.gmra.mxu0 %vm38_vm3, %v530_v27 }
 0x4dc   :  { %v618_v30 = vpop.f32.mrf.mxu0 }
 0x4dd   :  { %v619_v32 = vadd.f32 %v618_v30, %v547_v29 }
 0x4de   :  { %v620_v33 = vpop.f32.mrf.mxu0 }
 0x4df   :  { %623 = vst [vmem:[%s1090_s4] sm:$0xff] %v619_v32  ;;  %v621_v24 = vadd.f32 %v620_v33, %v548_v31 }
 0x4e1   :  { %624 = vst [vmem:[%s1090_s4 + $0x8] sm:$0xff] %v621_v24 }

</bundles_post_ra>
